<compile_context>
chip_gen: v7x
topology: tpu7x:2x2x1
jax: 0.10.0
libtpu: 0.0.40
codegen_flags: <defaults>
</compile_context>

<pallas_src>
import numpy as np
import jax
import jax.numpy as jnp
from jax import lax
from jax.experimental import pallas as pl
from jax.experimental.pallas import tpu as pltpu


def _round_up(x, m):
    return ((x + m - 1) // m) * m


def _vmem_budgets():
    """Generation-aware (per-buffer target, vmem_limit_bytes)."""
    vmem_bytes = 128 * 1024 * 1024
    try:
        info = pltpu.get_tpu_info()
        vmem_bytes = int(getattr(info, "vmem_capacity_bytes", vmem_bytes))
    except Exception:
        pass
    if vmem_bytes >= 96 * 1024 * 1024:
        # v5e / v6e: 128 MiB physical VMEM -> bigger tiles, fewer grid steps.
        return 24 * 1024 * 1024, 64 * 1024 * 1024
    # v7x: 64 MiB physical VMEM -> conservative budget / scoped limit.
    return 8 * 1024 * 1024, 32 * 1024 * 1024


# ----------------------------------------------------------------------------
# Pallas kernel 1: slicing matmul on flattened rows
#   Xf (B*N, d) @ W^T (d, L) -> (B*N, L)
# ----------------------------------------------------------------------------
def _slice_kernel(x_ref, wt_ref, o_ref):
    o_ref[...] = jnp.dot(
        x_ref[...], wt_ref[...], preferred_element_type=jnp.float32
    ).astype(o_ref.dtype)


def get_slices(X, W, out_dtype=jnp.float32):
    """X: (B, N, d) f32, W: (L, d) f32 (already weight-normalized). Returns (B, N, L)."""
    B, N, d = X.shape
    L = W.shape[0]
    BN = B * N
    Xf = X.reshape(BN, d)
    Wt = W.T  # (d, L)

    buf_budget, vmem_limit = _vmem_budgets()
    out_itemsize = jnp.dtype(out_dtype).itemsize

    # Lane (L) tiling: keep the whole W^T resident (one lane block) when it fits
    # comfortably; otherwise tile L (256-wide tiles suit the 256-wide MXU on v6e/v7x).
    w_bytes = 2 * d * L * 4
    if L % 128 == 0 and w_bytes > buf_budget // 2:
        tile_l = 256 if L % 256 == 0 else 128
    else:
        tile_l = L  # full-dim lane block (legal even if L < 128 / not 128-aligned)
    num_l = pl.cdiv(L, tile_l)

    # Row tiling: as big as the VMEM budget allows (targets the 85%+ HBM-roofline
    # regime), multiple of 8 (or the full row count). No padding of the row axis:
    # the last (partial) block reads undefined rows and its writeback is masked.
    w_resident = 2 * d * tile_l * 4
    per_row = 2 * (d * 4 + tile_l * out_itemsize)
    rows = max(8, (buf_budget - w_resident) // per_row)
    tile_m = int(min(2048, rows, BN))
    if tile_m < BN:
        tile_m = max(8, (tile_m // 8) * 8)
    else:
        tile_m = BN
    if num_l == 1 and BN >= 16 and pl.cdiv(BN, tile_m) < 2:
        # v7x has 2 TensorCores per chip; keep the parallel grid extent >= 2.
        tile_m = _round_up(-(-BN // 2), 8)
    num_m = pl.cdiv(BN, tile_m)
    # TODO(synk): for very large d_in (>= ~2K) add a K grid axis ('arbitrary') with an
    # f32 accumulator scratch to bound the X-block VMEM footprint.

    out = pl.pallas_call(
        _slice_kernel,
        out_shape=jax.ShapeDtypeStruct((BN, L), out_dtype),
        grid=(num_m, num_l),  # rows outer: X tile stays resident across the inner L loop
        in_specs=[
            pl.BlockSpec((tile_m, d), lambda i, j: (i, 0)),
            pl.BlockSpec((d, tile_l), lambda i, j: (0, j)),
        ],
        out_specs=pl.BlockSpec((tile_m, tile_l), lambda i, j: (i, j)),
        compiler_params=pltpu.CompilerParams(
            dimension_semantics=("parallel", "parallel"),
            vmem_limit_bytes=vmem_limit,
        ),
    )(Xf, Wt)

    return out.reshape(B, N, L)


# ----------------------------------------------------------------------------
# Pallas kernel 2: fused interpolation + weighted embedding reduction
#   out[b, l] = c[l] - sum_n G[n, l] * Xsorted[b, n, l]
# ----------------------------------------------------------------------------
def _embed_kernel(xs_ref, g_ref, c_ref, o_ref):
    # xs_ref: (tile_b, N, tile_l), g_ref: (N, tile_l), c_ref: (1, tile_l),
    # o_ref: (tile_b, 1, tile_l).  Chunked accumulation over N (8-row sublane chunks)
    # keeps live vector state small instead of materialising the full product.
    tile_b, n, tile_l = xs_ref.shape
    chunk = 8 if n >= 8 else n
    n_main = (n // chunk) * chunk
    n_chunks = n_main // chunk

    def body(i, acc):
        s = pl.multiple_of(i * chunk, chunk)
        xs = xs_ref[:, pl.ds(s, chunk), :].astype(jnp.float32)
        g = g_ref[pl.ds(s, chunk), :]
        return acc + jnp.sum(g[None, :, :] * xs, axis=1)

    acc = jnp.zeros((tile_b, tile_l), jnp.float32)
    if n_chunks > 0:
        acc = lax.fori_loop(0, n_chunks, body, acc, unroll=min(n_chunks, 8))
    if n_main < n:  # static remainder (< chunk rows)
        xs = xs_ref[:, n_main:, :].astype(jnp.float32)
        g = g_ref[n_main:, :]
        acc = acc + jnp.sum(g[None, :, :] * xs, axis=1)

    o_ref[:, 0, :] = c_ref[...] - acc


def fused_embed(Xsorted, G, c):
    """Xsorted: (B, N, L), G: (N, L) f32, c: (1, L) f32. Returns (B, L) f32."""
    B, N, L = Xsorted.shape
    buf_budget, vmem_limit = _vmem_budgets()

    # Lane tile: widest 128-multiple that divides L (better DMA run length), else full L.
    if L % 512 == 0:
        tile_l = min(L, 512)
    elif L % 256 == 0:
        tile_l = min(L, 256)
    elif L % 128 == 0:
        tile_l = 128
    else:
        tile_l = L
    num_l = L // tile_l

    xs_item = Xsorted.dtype.itemsize
    resident = 2 * (N + 1) * tile_l * 4                      # G + c tiles (stay resident)
    per_b = 2 * (N * tile_l * xs_item + tile_l * 4)          # xs + out tiles, double-buffered
    tile_b = int(max(1, min((buf_budget - resident) // per_b, B, 256)))
    # TODO(synk): for very large N, tile the set axis too (reduction grid axis marked
    # 'arbitrary' + f32 accumulator scratch); until then tile_b simply bottoms out at 1.
    if num_l == 1 and B >= 2:
        # v7x has 2 TensorCores per chip; keep the parallel grid extent >= 2.
        tile_b = min(tile_b, -(-B // 2))
    num_b = pl.cdiv(B, tile_b)   # no batch padding: edge block reads undefined rows,
                                 # its writeback is masked to the valid region.

    out = pl.pallas_call(
        _embed_kernel,
        # 3-D output so tile_b is unconstrained by the (8,128) rule on the last two dims.
        out_shape=jax.ShapeDtypeStruct((B, 1, L), jnp.float32),
        grid=(num_l, num_b),  # L outer: G / c blocks stay VMEM-resident across the inner loop
        in_specs=[
            pl.BlockSpec((tile_b, N, tile_l), lambda l, b: (b, 0, l)),
            pl.BlockSpec((N, tile_l), lambda l, b: (0, l)),
            pl.BlockSpec((1, tile_l), lambda l, b: (0, l)),
        ],
        out_specs=pl.BlockSpec((tile_b, 1, tile_l), lambda l, b: (b, 0, l)),
        compiler_params=pltpu.CompilerParams(
            dimension_semantics=("parallel", "parallel"),
            vmem_limit_bytes=vmem_limit,
        ),
    )(Xsorted, G, c)

    return out.reshape(B, L)


# ----------------------------------------------------------------------------
# Trace-time construction of the fixed interpolation operator A (M, N)
#   Matches the PyTorch interp1d (searchsorted-left, eps in slope denominator)
#   specialized to the uniform interior-linspace grids used by FPSWE.
# ----------------------------------------------------------------------------
def _interp_operator(N, M):
    if M == N:
        return None  # identity
    eps = float(np.finfo(np.float32).eps)
    x = np.linspace(0.0, 1.0, N + 2, dtype=np.float32)[1:-1]
    xnew = np.linspace(0.0, 1.0, M + 2, dtype=np.float32)[1:-1]
    ind = np.searchsorted(x, xnew, side="left")
    ind = np.clip(ind - 1, 0, N - 2)
    t = (xnew - x[ind]) / (eps + (x[ind + 1] - x[ind]))
    A = np.zeros((M, N), dtype=np.float32)
    A[np.arange(M), ind] += 1.0 - t
    A[np.arange(M), ind + 1] += t
    return jnp.asarray(A)


def _reference_argsort_is_identity(reference):
    """The fused G/c formulation drops the Rslices argsort+gather, which is only valid
    for a column-wise non-decreasing reference (the module builds an ascending linspace)."""
    try:
        ref_np = np.asarray(reference)
    except Exception:
        return True  # under tracing: trust the linspace construction
    if ref_np.shape[0] < 2:
        return True
    return bool(np.all(np.diff(ref_np, axis=0) >= 0.0))


# ----------------------------------------------------------------------------
# Forward pass
# ----------------------------------------------------------------------------
def fpswe_forward(X, W, reference, weight, interm_dtype=jnp.float32):
    """X: (B, N, d), W: (L, d), reference: (M, L), weight: (L, M) -> (B, L).
    interm_dtype=jnp.bfloat16 halves the HBM traffic of the slice->sort->embed
    intermediate (biggest relative win on v5e) at a small precision cost."""
    B, N, d = X.shape
    M, L = reference.shape

    assert _reference_argsort_is_identity(reference), (
        "FPSWE fused kernel requires a column-wise non-decreasing reference")

    # 1) slicing matmul (Pallas, true/unpadded L)
    Xslices = get_slices(X, W, out_dtype=interm_dtype)       # (B, N, L)

    # 2) sort over the set dimension (plain JAX / XLA) on the TRUE L columns
    Xsorted = jnp.sort(Xslices, axis=1)                      # (B, N, L)

    # 3) fold interp1d into a fixed (M, N) linear operator, fold the weighted
    #    reduction through it, and precompute the reference contribution.
    A = _interp_operator(N, M)                               # (M, N) or None
    WA = weight if A is None else weight @ A                 # (L, N)
    G = WA.T.astype(jnp.float32)                             # (N, L)
    c = jnp.sum(weight * reference.T, axis=1)[None, :].astype(jnp.float32)  # (1, L)

    # 4) fused embed kernel (Pallas)
    return fused_embed(Xsorted, G, c)                        # (B, L)


# ----------------------------------------------------------------------------
# Pure-JAX reference (faithful port of the PyTorch forward, incl. interp1d path)
# ----------------------------------------------------------------------------
def _interp1d_ref(x, y, xnew):
    eps = jnp.finfo(y.dtype).eps
    ind = jax.vmap(lambda xs, xn: jnp.searchsorted(xs, xn, side="left"))(x, xnew)
    slopes = (y[:, 1:] - y[:, :-1]) / (eps + (x[:, 1:] - x[:, :-1]))
    ind = jnp.clip(ind - 1, 0, x.shape[1] - 2)
    sel = lambda a: jnp.take_along_axis(a, ind, axis=1)
    return sel(y) + sel(slopes) * (xnew - sel(x))


def fpswe_reference(X, W, reference, weight):
    B, N, d = X.shape
    M, L = reference.shape
    Xslices = jnp.einsum("bnd,ld->bnl", X, W)
    Xs = jnp.sort(Xslices, axis=1)
    if M == N:
        Xi = Xs
    else:
        x = jnp.tile(jnp.linspace(0.0, 1.0, N + 2, dtype=jnp.float32)[1:-1][None, :], (B * L, 1))
        xn = jnp.tile(jnp.linspace(0.0, 1.0, M + 2, dtype=jnp.float32)[1:-1][None, :], (B * L, 1))
        y = jnp.transpose(Xs, (0, 2, 1)).reshape(B * L, N)
        Xi = jnp.transpose(_interp1d_ref(x, y, xn).reshape(B, L, M), (0, 2, 1))
    Rslices = jnp.broadcast_to(reference[None, :, :], Xi.shape)
    Rind = jnp.argsort(Rslices, axis=1)
    gathered = jnp.take_along_axis(Xi, Rind, axis=1)
    emb = Rslices - gathered
    return jnp.einsum("lm,bml->bl", weight, emb)


# ----------------------------------------------------------------------------
# Deterministic parameter construction (mirrors the PyTorch __init__)
# ----------------------------------------------------------------------------
def make_params(key, d_in, num_ref_points, num_projections):
    M, L = num_ref_points, num_projections
    kv, kw = jax.random.split(key, 2)

    reference = jnp.tile(jnp.linspace(-1.0, 1.0, M, dtype=jnp.float32)[:, None], (1, L))

    if L <= d_in:
        v = jnp.eye(L, d_in, dtype=jnp.float32)
    else:
        v = jax.random.normal(kv, (L, d_in), dtype=jnp.float32)
    W = v / jnp.linalg.norm(v, axis=1, keepdims=True)          # (L, d_in)

    a = float(np.sqrt(6.0 / (L + M)))
    weight = jax.random.uniform(kw, (L, M), dtype=jnp.float32, minval=-a, maxval=a)

    return W, reference, weight


if __name__ == "__main__":
    key = jax.random.PRNGKey(0)
    kx, kp = jax.random.split(key)

    def run_case(B, N, d_in, M, L):
        X = jax.random.normal(kx, (B, N, d_in), dtype=jnp.float32)
        W, reference, weight = make_params(kp, d_in, M, L)
        out = jax.block_until_ready(fpswe_forward(X, W, reference, weight))
        ref = jax.block_until_ready(fpswe_reference(X, W, reference, weight))
        assert out.shape == (B, L), out.shape
        err = float(np.max(np.abs(np.asarray(out) - np.asarray(ref))))
        assert np.allclose(np.asarray(out), np.asarray(ref), rtol=1e-3, atol=1e-3), err

    # 1) M != N exercises the interpolation path; L=32 exercises full-dim (<128) lane blocks.
    run_case(B=2, N=8, d_in=4, M=16, L=32)
    # 2) M == N (identity interpolation operator).
    run_case(B=2, N=8, d_in=4, M=8, L=32)
    # 3) 128-multiple L (lane-tiled path), uneven row/batch tiling (masked partial
    #    edge blocks) and an N-chunk remainder in the embed kernel.
    run_case(B=3, N=20, d_in=8, M=16, L=256)

    print("KERNEL_OK")
</pallas_src>

<mosaic_0001>
module attributes {stable_mosaic.version = 11 : i64} {
  func.func @_slice_kernel(%arg0: i32, %arg1: i32, %arg2: memref<8x4xf32, #tpu.memory_space<vmem>>, %arg3: memref<4x32xf32, #tpu.memory_space<vmem>>, %arg4: memref<8x32xf32, #tpu.memory_space<vmem>>) attributes {dimension_semantics = [#tpu.dimension_semantics<parallel>, #tpu.dimension_semantics<parallel>], iteration_bounds = array<i64: 2, 1>, scalar_prefetch = 0 : i64, scratch_operands = 0 : i64, tpu.core_type = #tpu.core_type<tc>, window_params = [{transform_indices = @transform_0, window_bounds = array<i64: 8, 4>}, {transform_indices = @transform_1, window_bounds = array<i64: 4, 32>}, {transform_indices = @transform_2, window_bounds = array<i64: 8, 32>}]} {
    %c0 = arith.constant 0 : index
    %c0_0 = arith.constant 0 : index
    %0 = vector.load %arg2[%c0, %c0_0] : memref<8x4xf32, #tpu.memory_space<vmem>>, vector<8x4xf32>
    %c0_1 = arith.constant 0 : index
    %c0_2 = arith.constant 0 : index
    %1 = vector.load %arg3[%c0_1, %c0_2] : memref<4x32xf32, #tpu.memory_space<vmem>>, vector<4x32xf32>
    %cst = arith.constant dense<0.000000e+00> : vector<8x32xf32>
    %2 = tpu.matmul %0, %1, %cst {dimension_numbers = #tpu.dot_dimension_numbers<[1], [0], [0], [1], [0, 0, 1, 1], [], []>} : vector<8x4xf32>, vector<4x32xf32>, vector<8x32xf32> -> vector<8x32xf32>
    %c0_3 = arith.constant 0 : index
    %c0_4 = arith.constant 0 : index
    %3 = vector.load %arg4[%c0_3, %c0_4] : memref<8x32xf32, #tpu.memory_space<vmem>>, vector<8x32xf32>
    tpu.vector_store %arg4[%c0_3, %c0_4], %2 {strides = array<i32>} : memref<8x32xf32, #tpu.memory_space<vmem>>, vector<8x32xf32>,
    return
  }
  func.func @transform_0(%arg0: i32, %arg1: i32) -> (i32, i32) {
    %c0_i32 = arith.constant 0 : i32
    %c0_i32_0 = arith.constant 0 : i32
    return %arg0, %c0_i32 : i32, i32
  }
  func.func @transform_1(%arg0: i32, %arg1: i32) -> (i32, i32) {
    %c0_i32 = arith.constant 0 : i32
    %c0_i32_0 = arith.constant 0 : i32
    return %c0_i32, %arg1 : i32, i32
  }
  func.func @transform_2(%arg0: i32, %arg1: i32) -> (i32, i32) {
    %c0_i32 = arith.constant 0 : i32
    return %arg0, %arg1 : i32, i32
  }
}

</mosaic_0001>

<bundles_post_ra>
// kernel: tpu_custom_call.1
= control target key start
LH: loop header
LB: loop body
LE: loop exit
PB: predicated region body
PF: predicated region fallthrough
CT: control target
= control target key end

     0   :  { %7 = vsyncpa [#allocation3], 0  ;;  %s862_s0 = inlined_call_operand.hbm [shape: f32[16,4], index: 0, kind: input, shape index: {}]   ;;  %s863_s1 = inlined_call_operand.hbm [shape: f32[4,32], index: 1, kind: input, shape index: {}]   ;;  %s864_s2 = inlined_call_operand.hbm [shape: f32[16,32], index: 2, kind: output, shape index: {}]  }
   0x1   :  { %9 = vsyncpa [#allocation3 + $0x1], 0 }
   0x2   :  { %10 = vsyncpa [#allocation6], 0 }
   0x3   :  { %11 = vsyncpa [#allocation4], 0 }
   0x4   :  { %13 = vsyncpa [#allocation4 + $0x1], 0  ;;  %s646_s9 = smov 0   ;;  %s648_s10 = smov 0  }
   0x5   :  { %s650_s11 = smov 0   ;;  %s652_s12 = smov 0  }
   0x6   :  { %s654_s13 = smov 0   ;;  %s656_s14 = smov 0  }
   0x7 LB: > { %s381_s15 = sadd.s32 4294967295, %s624_s14   ;;  %s382_s16 = sadd.s32 4294967294, %s624_s14   ;;  %s624_s14 = sphi %s656_s14, %s19_s14   ;;  %s620_s13 = sphi %s654_s13, %s889_s13   ;;  %s616_s12 = sphi %s652_s12, %s888_s12   ;;  %s612_s11 = sphi %s650_s11, %s887_s11   ;;  %s608_s10 = sphi %s648_s10, %s886_s10   ;;  %s604_s9 = sphi %s646_s9, %s885_s9  }
   0x8   : > { %p51_p0 = scmp.ne.s32.totalorder %s608_s10, %s604_s9  ;;  %p680_p1 = scmp.eq.s32.totalorder %s381_s15, 0 }
   0x9   : > { %p684_p2 = scmp.eq.s32.totalorder %s381_s15, 1  ;;  %p109_p3 = scmp.eq.s32.totalorder %s382_s16, 1 }
   0xa   : > { %s869_s17 = scalar_select %p680_p1, 1, 0 }
   0xb   : > { %s870_s18 = scalar_select %p684_p2, 1, 0 }
   0xc   : > { %p690_p4 = por %p680_p1, %p51_p0  ;;  %p383_p5 = scmp.ge.s32.totalorder %s624_s14, 1 }
   0xd   : > { %p695_p6 = por %p109_p3, %p51_p0  ;;  %p116_p7 = scmp.lt.s32.totalorder %s624_s14, 3 }
   0xe   : > { %s871_s19 = scalar_select %p690_p4, 1, 0 }
   0xf   : > { %s872_s20 = scalar_select %p695_p6, 1, 0 }
  0x10   : > { %p700_p8 = pnand %p383_p5, %p116_p7  ;;  %s626_s22 = smov [#allocation5]  }
  0x11   : > { %s131_s23 = sshll.u32 %s626_s22, 4  ;;  %s31_s25 = sadd.s32 1, %s620_s13  ;;  %s132_s23 = int_to_ptr.vmem [resolvable:$true] %s131_s23 }
  0x12   : > { %s873_s21 = scalar_select %p700_p8, 1, 0 }
  0x13   : > { %p413_p10 = pneg %p700_p8  ;;  %s38_s26 = sadd.s32 1, %s612_s11 }
  0x14   : > { %p715_p12 = scmp.ge.s32.totalorder %s31_s25, 2  ;;  %s480_s30 = scalar_lea.hbm %s863_s1, 64 }
  0x15   : > { %p709_p11 = pnand %p413_p10, %p680_p1  ;;  %p481_p13 = scmp.ne.s32.totalorder %s863_s1, %s480_s30 }
  0x16   : > { %s875_s27 = scalar_select %p715_p12, 1, 0 }
  0x17   : > { %p482_p0 = pneg %p709_p11  ;;  %p487_p7 = scmp.lt.u32.totalorder %s480_s30, %s863_s1 }
  0x19   : > { %p483_p3 = pnand %p482_p0, %p481_p13 }
  0x1b   : > { %p484_p5 = pneg %p483_p3 }
  0x1d   : > { %p489_p10 = pnand %p487_p7, %p484_p5 }
  0x1f   : > { %492 = shalt.err (!%p489_p10)
}
  0x20   : > { %s493_s7 = scalar_lea.vmem %s132_s23, 64  ;;  %p501_p4 = scmp.lt.s32.totalorder %s132_s23, %s132_s23 }
  0x21   : > { %p494_p9 = scmp.ne.s32.totalorder %s132_s23, %s493_s7  ;;  %p502_p8 = scmp.lt.s32.totalorder %s493_s7, %s493_s7 }
  0x23   : > { %p496_p6 = pnand %p494_p9, %p482_p0  ;;  %p503_p2 = por %p502_p8, %p501_p4 }
  0x25   : > { %p497_p1 = pneg %p496_p6 }
  0x27   : > { %p504_p12 = pnand %p503_p2, %p497_p1 }
  0x29   : > { %507 = shalt.err (!%p504_p12)
}
  0x2a   : > { %416 = dma.hbm_to_vmem [thread:$0]  (!%p709_p11), %s863_s1, 64, %s132_s23, [#allocation6]  }
  0x2b   : > { %p876_p4 = scmp.ne.s32.totalorder %s875_s27, 0  ;;  %p45_p1 = scmp.ne.s32.totalorder %s612_s11, %s608_s10 }
  0x2c   : > { %p46_p2 = scmp.eq.s32.totalorder %s624_s14, 0  ;;  %p426_p6 = scmp.lt.s32.totalorder %s624_s14, 2 }
  0x2d   : > { %s891_s25 = smov (%p876_p4, %s31_s25), 0  ;;  %p877_p12 = scmp.ne.s32.totalorder %s870_s18, 0 }
  0x2e   : > { %s35_s16 = ssub.s32 %s620_s13, %s891_s25  ;;  %p47_p9 = por %p46_p2, %p45_p1 }
  0x2f   : > { %p36_p8 = scmp.eq.s32.totalorder %s35_s16, 0  ;;  %p747_p13 = por %p877_p12, %p45_p1 }
  0x30   : > { %s142_s24 = sand.u32 1, %s612_s11   ;;  %s387_s27 = sshll.u32 %s620_s13, 7 }
  0x31   : > { %s755_s28 = scalar_select %p36_p8, %s612_s11, %s38_s26  }
  0x32   : > { %s386_s23 = sshll.u32 %s142_s24, 3  ;;  %s761_s3 = scalar_lea.hbm %s862_s0, %s387_s27 }
  0x33   : > { %s146_s18 = scalar_lea.vmem [#allocation2], %s386_s23  ;;  %p765_p11 = pnand %p426_p6, %p47_p9 }
  0x34   : > { %s153_s4 = sshll.u32 %s146_s18, 4  ;;  %s143_s26 = scalar_lea.sflag [#allocation3], %s142_s24  ;;  %s763_s4 = int_to_ptr.vmem [resolvable:$true] %s153_s4 }
  0x35   : > { %s508_s6 = scalar_lea.hbm %s761_s3, 128  ;;  %p510_p3 = pneg %p765_p11 }
  0x36   : > { %p509_p0 = scmp.ne.s32.totalorder %s761_s3, %s508_s6  ;;  %s513_s15 = scalar_lea.hbm %s862_s0, 256 }
  0x37   : > { %p514_p10 = scmp.lt.u32.totalorder %s761_s3, %s862_s0  ;;  %p515_p4 = scmp.lt.u32.totalorder %s513_s15, %s508_s6 }
  0x38   : > { %p511_p5 = pnand %p510_p3, %p509_p0  ;;  %p517_p2 = scmp.lt.u32.totalorder %s508_s6, %s761_s3 }
  0x39   : > { %p516_p1 = por %p515_p4, %p514_p10 }
  0x3a   : > { %p512_p7 = pneg %p511_p5 }
  0x3b   : > { %p518_p6 = por %p517_p2, %p516_p1 }
  0x3d   : > { %p519_p8 = pnand %p518_p6, %p512_p7 }
  0x3f   : > { %522 = shalt.err (!%p519_p8)
}
  0x40   : > { %s523_s24 = scalar_lea.vmem %s763_s4, 128  ;;  %s627_s27 = smov [#allocation2]  }
  0x41   : > { %p524_p9 = scmp.ne.s32.totalorder %s763_s4, %s523_s24  ;;  %s528_s29 = sshll.u32 %s627_s27, 4  ;;  %s529_s29 = int_to_ptr.vmem [resolvable:$false] %s528_s29 }
  0x42   : > { %s530_s30 = scalar_lea.vmem %s529_s29, 256  ;;  %p531_p5 = scmp.lt.s32.totalorder %s763_s4, %s529_s29 }
  0x43   : > { %p526_p12 = pnand %p524_p9, %p510_p3  ;;  %p532_p10 = scmp.lt.s32.totalorder %s530_s30, %s523_s24 }
  0x45   : > { %p527_p0 = pneg %p526_p12  ;;  %p533_p4 = por %p532_p10, %p531_p5 }
  0x47   : > { %p534_p1 = pnand %p533_p4, %p527_p0 }
  0x49   : > { %537 = shalt.err (!%p534_p1)
}
  0x4a   : > { %420 = dma.hbm_to_vmem [thread:$0]  (!%p765_p11), %s761_s3, 128, %s763_s4, %s143_s26  }
  0x4b   : > { %p880_p7 = scmp.ne.s32.totalorder %s873_s21, 0 }
  0x4c   : > { %s797_s18 = sand.u32 (!%p880_p7), 1, %s608_s10   ;;  %p881_p3 = scmp.ne.s32.totalorder (!%p880_p7), %s871_s19, 0 }
  0x4d   : > { %162 = sbr.rel (%p880_p7) target bundleno = 317 (0x13d), region = 28  ;;  %s389_s6 = sshll.u32 (!%p880_p7), %s797_s18, 3 }
  0x4e   : > { %s165_s7 = scalar_lea.sflag (!%p880_p7), [#allocation3], %s797_s18  ;;  %s168_s8 = scalar_lea.vmem (!%p880_p7), [#allocation2], %s389_s6 }
  0x54   : > { %591 = dma.done.wait (%p881_p3), %s165_s7, 128  }
  0x55   : > { %593 = vsyncadd (%p881_p3), %s165_s7, 4294967168  ;;  %p882_p2 = scmp.ne.s32.totalorder %s869_s17, 0 }
  0x57   : > { %595 = dma.done.wait (%p882_p2), [#allocation6], 64  }
  0x58   : > { %597 = vsyncadd (%p882_p2), [#allocation6], 4294967232  ;;  %v628_v0 = vmov 0.0   ;;  %vm629_vm0 = vmmov 0   ;;  %vm199_vm1 = vcmask 1043456   ;;  %vm195_vm2 = vcmask 31744  }
  0x59   : > { %400 = vmatprep.subr.mxu0 %v628_v0  ;;  %402 = vmatprep.mubr.msk.f32.mxu0 %vm629_vm0, %v628_v0  ;;  %v194_v1 = vld [vmem:[#allocation5] sm:$0xf]  ;;  %v193_v2 = vld [vmem:[%s168_s8] sm:$0xff]  ;;  %s395_s19 = sshll.u32 %s616_s12, 7  ;;  %s192_s21 = scalar_lea.vmem [#allocation7], %s389_s6  ;;  %vm273_vm3 = vcmask 261120  }
  0x5a   : > { %401 = vmatpush3.msk.msra.mxu0 %vm199_vm1, %v194_v1  ;;  %s290_s3 = sshll.u32 %s192_s21, 4  ;;  %s813_s5 = scalar_lea.hbm %s864_s2, %s395_s19  ;;  %s815_s3 = int_to_ptr.vmem [resolvable:$true] %s290_s3 }
  0x5b   : > { %403 = vmatmul.mubr.msk.f32.vlgmr.msra.gmra.mrb[0].mxu0 %vm195_vm2, %v193_v2  ;;  %s276_s26 = scalar_lea.sflag [#allocation4], %s797_s18  ;;  %s538_s15 = scalar_lea.vmem %s815_s3, 128 }
  0x5c   : > { %p539_p11 = scmp.ne.s32.totalorder %s815_s3, %s538_s15  ;;  %s630_s12 = smov [#allocation7]  }
  0x5d   : > { %s542_s16 = sshll.u32 %s630_s12, 4  ;;  %s543_s16 = int_to_ptr.vmem [resolvable:$false] %s542_s16 }
  0x5e   : > { %p540_p6 = pnand %p539_p11, %p747_p13  ;;  %s544_s23 = scalar_lea.vmem %s543_s16, 256 }
  0x5f   : > { %p545_p9 = scmp.lt.s32.totalorder %s815_s3, %s543_s16  ;;  %p546_p12 = scmp.lt.s32.totalorder %s544_s23, %s538_s15 }
  0x60   : > { %p541_p8 = pneg %p540_p6 }
  0x61   : > { %p547_p0 = por %p546_p12, %p545_p9 }
  0x63   : > { %p548_p5 = pnand %p547_p0, %p541_p8 }
 0x12e   : > { %v269_v3 = vpop.f32.mrb[0].mxu0 }
 0x12f   : > { %274 = vst.msk [vmem:[%s192_s21] sm:$0xff] %vm273_vm3, %v269_v3  ;;  %v404_v4 = vpop.f32.mrb[1].mxu0 }
 0x130   : > { %551 = shalt.err (!%p548_p5)
}
 0x131   : > { %s552_s24 = scalar_lea.hbm %s813_s5, 128  ;;  %s556_s30 = scalar_lea.hbm %s864_s2, 256 }
 0x132   : > { %p553_p10 = scmp.ne.s32.totalorder %s813_s5, %s552_s24  ;;  %p557_p7 = scmp.lt.u32.totalorder %s813_s5, %s864_s2 }
 0x133   : > { %p558_p3 = scmp.lt.u32.totalorder %s556_s30, %s552_s24  ;;  %p560_p11 = scmp.lt.u32.totalorder %s552_s24, %s813_s5 }
 0x134   : > { %p554_p4 = pnand %p553_p10, %p747_p13 }
 0x135   : > { %p559_p2 = por %p558_p3, %p557_p7 }
 0x136   : > { %p555_p1 = pneg %p554_p4 }
 0x137   : > { %p561_p6 = por %p560_p11, %p559_p2 }
 0x139   : > { %p562_p8 = pnand %p561_p6, %p555_p1 }
 0x13b   : > { %565 = shalt.err (!%p562_p8)
}
 0x13c   : > { %411 = dma.vmem_to_hbm [thread:$0]  (%p747_p13), %s815_s3, 128, %s813_s5, %s276_s26  }
 0x13d PF: > { %s302_s7 = sand.u32 1, %s604_s9   ;;  %p883_p9 = scmp.ne.s32.totalorder %s872_s20, 0 }
 0x13e   : > { %p884_p12 = scmp.ge.s32.totalorder %s624_s14, 2  ;;  %s303_s8 = scalar_lea.sflag [#allocation4], %s302_s7 }
 0x140   : > { %p422_p0 = pnand %p884_p12, %p883_p9 }
 0x142   : > { %599 = dma.done.wait (!%p422_p0), %s303_s8, 128  }
 0x143   : > { %601 = vsyncadd (!%p422_p0), %s303_s8, 4294967168  ;;  %s19_s14 = sadd.s32 1, %s624_s14   ;;  %s885_s9 = smov %s608_s10 }
 0x144   : > { %p16_p5 = scmp.ge.s32.totalorder %s19_s14, 4   ;;  %s886_s10 = smov %s612_s11 }
 0x145   : > { %s887_s11 = smov %s755_s28  ;;  %s888_s12 = smov %s620_s13 }
 0x146   : > { %s889_s13 = smov %s891_s25  ;;  %18 = sbr.rel (!%p16_p5) target bundleno = 7 (0x7), region = 78 }
 0x14d   :  { %308 = vsyncpa [#allocation3], 1 }
 0x14e   :  { %310 = vsyncpa [#allocation3 + $0x1], 1 }
 0x14f   :  { %311 = vsyncpa [#allocation6], 1 }
 0x150   :  { %312 = vsyncpa [#allocation4], 1 }
 0x151   :  { %314 = vsyncpa [#allocation4 + $0x1], 1 }

</bundles_post_ra>
